<compile_context>
chip_gen: v7x
topology: tpu7x:2x2x1
jax: 0.10.0
libtpu: 0.0.40
codegen_flags: <defaults>
</compile_context>

<pallas_src>
import functools

import jax
import jax.numpy as jnp
from jax.experimental import pallas as pl
from jax.experimental.pallas import tpu as pltpu


def _mha_kernel(q_ref, k_ref, v_ref,
                wq_t_ref, bq_ref, wk_t_ref, bk_ref, wv_t_ref, bv_ref,
                o_ref,
                *, num_heads, dim_qk, dim_v):
    Bt, Lq, dim = q_ref.shape
    _, Lk, _ = k_ref.shape
    in_dtype = q_ref.dtype

    # ---- Q/K/V projections: fold (Bt, L) into M so each projection is one
    #      2-D MXU matmul.  Operands keep their input dtype; accumulate f32.
    q2 = q_ref[...].reshape(Bt * Lq, dim)
    k2 = k_ref[...].reshape(Bt * Lk, dim)
    v2 = v_ref[...].reshape(Bt * Lk, dim)

    # 1/sqrt(dim_qk) is already folded into wq_t / bq by the wrapper.
    qp = (jnp.dot(q2, wq_t_ref[...], preferred_element_type=jnp.float32)
          + bq_ref[...].astype(jnp.float32))                    # (Bt*Lq, dim_qk) f32
    kp = (jnp.dot(k2, wk_t_ref[...], preferred_element_type=jnp.float32)
          + bk_ref[...].astype(jnp.float32))                    # (Bt*Lk, dim_qk) f32
    vp = (jnp.dot(v2, wv_t_ref[...], preferred_element_type=jnp.float32)
          + bv_ref[...].astype(jnp.float32))                    # (Bt*Lk, dim_v)  f32

    # Cast MXU operands back to the input dtype (bf16-friendly).  Softmax math
    # below stays f32 via preferred_element_type.
    qp = qp.astype(in_dtype)
    kp = kp.astype(in_dtype)
    vp = vp.astype(in_dtype)

    d_qk_h = dim_qk // num_heads
    d_v_h = dim_v // num_heads

    head_outs = []
    for h in range(num_heads):           # static, small head count
        # Head slices are contiguous column groups; for d_head >= 128 these
        # are vreg-aligned and free.  Single batch dim -> supported dots.
        qh = qp[:, h * d_qk_h:(h + 1) * d_qk_h].reshape(Bt, Lq, d_qk_h)
        kh = kp[:, h * d_qk_h:(h + 1) * d_qk_h].reshape(Bt, Lk, d_qk_h)
        vh = vp[:, h * d_v_h:(h + 1) * d_v_h].reshape(Bt, Lk, d_v_h)

        # Scores (scale pre-folded into the Q projection).
        s = jnp.einsum('bqd,bkd->bqk', qh, kh,
                       preferred_element_type=jnp.float32)       # (Bt,Lq,Lk) f32
        s = s - jnp.max(s, axis=-1, keepdims=True)
        p = jnp.exp(s)
        # Reciprocal on the EUP slot; normalize AFTER the PV matmul so the
        # VPU multiply is O(Lq*d_v), not O(Lq*Lk).
        inv_l = pl.reciprocal(jnp.sum(p, axis=-1, keepdims=True), approx=True)

        o_h = jnp.einsum('bqk,bkd->bqd', p.astype(in_dtype), vh,
                         preferred_element_type=jnp.float32)     # (Bt,Lq,d_v_h)
        head_outs.append(o_h * inv_l)

    out = jnp.concatenate(head_outs, axis=-1)                    # (Bt,Lq,dim_v)
    # Single lane-dense (multiple-of-128 lanes) unmasked store.
    o_ref[...] = out.reshape(Bt, 1, Lq * dim_v).astype(o_ref.dtype)


def multi_head_attention(q, k, v, params, *, num_heads, batch_tile=None):
    """q,k,v: (B, L, dim).  params: dict with wq,bq,wk,bk,wv,bv (PyTorch
    nn.Linear convention: weight is (out_features, in_features)).
    Returns (B, Lq, dim_v)."""
    B, Lq, dim = q.shape
    _, Lk, _ = k.shape
    assert k.shape[0] == B and v.shape[0] == B
    assert v.shape[1] == Lk, "len_k and len_v must be equal"
    assert k.shape[2] == dim and v.shape[2] == dim, "dimension mismatch"

    dim_qk = params["wq"].shape[0]
    dim_v = params["wv"].shape[0]
    assert dim % num_heads == 0 and dim_qk % num_heads == 0 \
        and dim_v % num_heads == 0, "dims must be divisible by num_heads"

    # Default: grid extent >= 2 so both v7x TensorCores get work and the
    # pipeline has something to overlap on single-TC parts.
    if batch_tile is None:
        Bt = B // 2 if (B % 2 == 0 and B >= 2) else B
    else:
        Bt = batch_tile
    assert B % Bt == 0

    # Module semantics: scores / sqrt(dim_qk)  (FULL qk dim).  Fold the scale
    # into the Q projection in the wrapper -> zero in-kernel cost.
    scale = 1.0 / (dim_qk ** 0.5)

    # Pre-transpose weights once in the wrapper (no in-kernel transposes) and
    # cast them to the activation dtype so MXU operands match (bf16-friendly).
    wq_t = (params["wq"].T * scale).astype(q.dtype)   # (dim, dim_qk), scaled
    wk_t = params["wk"].T.astype(q.dtype)             # (dim, dim_qk)
    wv_t = params["wv"].T.astype(q.dtype)             # (dim, dim_v)
    bq = (params["bq"] * scale).astype(jnp.float32).reshape(1, dim_qk)
    bk = params["bk"].astype(jnp.float32).reshape(1, dim_qk)
    bv = params["bv"].astype(jnp.float32).reshape(1, dim_v)

    kernel = functools.partial(_mha_kernel, num_heads=num_heads,
                               dim_qk=dim_qk, dim_v=dim_v)

    rep2d = lambda shp: pl.BlockSpec(shp, lambda b: (0, 0))   # grid-invariant

    out_flat = pl.pallas_call(
        kernel,
        # Lane-dense output: last dim Lq*dim_v (multiple of 128 here) so the
        # store is unmasked; reshaped back to (B, Lq, dim_v) below (free).
        out_shape=jax.ShapeDtypeStruct((B, 1, Lq * dim_v), q.dtype),
        grid_spec=pltpu.PrefetchScalarGridSpec(
            num_scalar_prefetch=0,
            grid=(B // Bt,),
            in_specs=[
                pl.BlockSpec((Bt, Lq, dim), lambda b: (b, 0, 0)),   # q
                pl.BlockSpec((Bt, Lk, dim), lambda b: (b, 0, 0)),   # k
                pl.BlockSpec((Bt, Lk, dim), lambda b: (b, 0, 0)),   # v
                rep2d((dim, dim_qk)),                               # wq.T*scale
                rep2d((1, dim_qk)),                                 # bq*scale
                rep2d((dim, dim_qk)),                               # wk.T
                rep2d((1, dim_qk)),                                 # bk
                rep2d((dim, dim_v)),                                # wv.T
                rep2d((1, dim_v)),                                  # bv
            ],
            out_specs=pl.BlockSpec((Bt, 1, Lq * dim_v), lambda b: (b, 0, 0)),
        ),
        compiler_params=pltpu.CompilerParams(
            dimension_semantics=("parallel",),
            # Above the 32 MiB scoped default (v6e benefits from bigger
            # tiles), but under v7x's 64 MiB physical VMEM.  Re-derive when
            # growing Bt/Lq/Lk tiles for production shapes.
            vmem_limit_bytes=48 * 1024 * 1024,
        ),
    )(q, k, v, wq_t, bq, wk_t, bk, wv_t, bv)

    return out_flat.reshape(B, Lq, dim_v)


def _reference(q, k, v, params, *, num_heads):
    """Pure-JAX f32 reference mirroring the PyTorch forward (mask=None, dropout=0)."""
    B, Lq, dim = q.shape
    _, Lk, _ = k.shape
    dim_qk = params["wq"].shape[0]
    dim_v = params["wv"].shape[0]

    qp = q @ params["wq"].T + params["bq"]
    kp = k @ params["wk"].T + params["bk"]
    vp = v @ params["wv"].T + params["bv"]

    qp = qp.reshape(B, Lq, num_heads, dim_qk // num_heads).transpose(0, 2, 1, 3)
    kp = kp.reshape(B, Lk, num_heads, dim_qk // num_heads).transpose(0, 2, 1, 3)
    vp = vp.reshape(B, Lk, num_heads, dim_v // num_heads).transpose(0, 2, 1, 3)

    attn = jnp.einsum("bhqd,bhkd->bhqk", qp, kp) / (dim_qk ** 0.5)
    attn = jax.nn.softmax(attn, axis=-1)
    out = jnp.einsum("bhqk,bhkd->bhqd", attn, vp)
    out = out.transpose(0, 2, 1, 3).reshape(B, Lq, dim_v)
    return out


if __name__ == "__main__":
    # Module hyperparameters (small, consistent with the PyTorch __init__ asserts).
    dim = 32
    dim_qk = 32
    dim_v = 32
    num_heads = 2

    B, Lq, Lk = 2, 8, 8

    key = jax.random.PRNGKey(0)
    ks = jax.random.split(key, 9)

    # Deterministic parameter init (PyTorch nn.Linear style: U(-1/sqrt(fan_in), 1/sqrt(fan_in))).
    bound = 1.0 / (dim ** 0.5)
    params = {
        "wq": jax.random.uniform(ks[0], (dim_qk, dim), jnp.float32, -bound, bound),
        "bq": jax.random.uniform(ks[1], (dim_qk,), jnp.float32, -bound, bound),
        "wk": jax.random.uniform(ks[2], (dim_qk, dim), jnp.float32, -bound, bound),
        "bk": jax.random.uniform(ks[3], (dim_qk,), jnp.float32, -bound, bound),
        "wv": jax.random.uniform(ks[4], (dim_v, dim), jnp.float32, -bound, bound),
        "bv": jax.random.uniform(ks[5], (dim_v,), jnp.float32, -bound, bound),
    }

    q = jax.random.normal(ks[6], (B, Lq, dim), jnp.float32)
    k = jax.random.normal(ks[7], (B, Lk, dim), jnp.float32)
    v = jax.random.normal(ks[8], (B, Lk, dim), jnp.float32)

    out = multi_head_attention(q, k, v, params, num_heads=num_heads)
    out = jax.block_until_ready(out)

    ref = _reference(q, k, v, params, num_heads=num_heads)
    assert out.shape == (B, Lq, dim_v), out.shape
    # Tolerance loosened slightly vs pure-f32: approx (EUP) reciprocal in the
    # softmax denominator.  Inputs are f32 here so no bf16 error enters.
    assert jnp.allclose(out, ref, atol=2e-2, rtol=2e-2), "mismatch vs reference"

    print("KERNEL_OK")
</pallas_src>

<mosaic_0001>
module attributes {stable_mosaic.version = 11 : i64} {
  func.func @_mha_kernel(%arg0: i32, %arg1: memref<1x8x32xf32, #tpu.memory_space<vmem>>, %arg2: memref<1x8x32xf32, #tpu.memory_space<vmem>>, %arg3: memref<1x8x32xf32, #tpu.memory_space<vmem>>, %arg4: memref<32x32xf32, #tpu.memory_space<vmem>>, %arg5: memref<1x32xf32, #tpu.memory_space<vmem>>, %arg6: memref<32x32xf32, #tpu.memory_space<vmem>>, %arg7: memref<1x32xf32, #tpu.memory_space<vmem>>, %arg8: memref<32x32xf32, #tpu.memory_space<vmem>>, %arg9: memref<1x32xf32, #tpu.memory_space<vmem>>, %arg10: memref<1x1x256xf32, #tpu.memory_space<vmem>>) attributes {dimension_semantics = [#tpu.dimension_semantics<parallel>], iteration_bounds = array<i64: 2>, scalar_prefetch = 0 : i64, scratch_operands = 0 : i64, tpu.core_type = #tpu.core_type<tc>, window_params = [{transform_indices = @transform_0, window_bounds = array<i64: 1, 8, 32>}, {transform_indices = @transform_1, window_bounds = array<i64: 1, 8, 32>}, {transform_indices = @transform_2, window_bounds = array<i64: 1, 8, 32>}, {pipeline_mode = #tpu.pipeline_mode<synchronous>, transform_indices = @transform_3, window_bounds = array<i64: 32, 32>}, {pipeline_mode = #tpu.pipeline_mode<synchronous>, transform_indices = @transform_4, window_bounds = array<i64: 1, 32>}, {pipeline_mode = #tpu.pipeline_mode<synchronous>, transform_indices = @transform_5, window_bounds = array<i64: 32, 32>}, {pipeline_mode = #tpu.pipeline_mode<synchronous>, transform_indices = @transform_6, window_bounds = array<i64: 1, 32>}, {pipeline_mode = #tpu.pipeline_mode<synchronous>, transform_indices = @transform_7, window_bounds = array<i64: 32, 32>}, {pipeline_mode = #tpu.pipeline_mode<synchronous>, transform_indices = @transform_8, window_bounds = array<i64: 1, 32>}, {transform_indices = @transform_9, window_bounds = array<i64: 1, 1, 256>}]} {
    %c0 = arith.constant 0 : index
    %c0_0 = arith.constant 0 : index
    %c0_1 = arith.constant 0 : index
    %0 = vector.load %arg1[%c0, %c0_0, %c0_1] : memref<1x8x32xf32, #tpu.memory_space<vmem>>, vector<1x8x32xf32>
    %1 = vector.shape_cast %0 : vector<1x8x32xf32> to vector<8x32xf32>
    %c0_2 = arith.constant 0 : index
    %c0_3 = arith.constant 0 : index
    %c0_4 = arith.constant 0 : index
    %2 = vector.load %arg2[%c0_2, %c0_3, %c0_4] : memref<1x8x32xf32, #tpu.memory_space<vmem>>, vector<1x8x32xf32>
    %3 = vector.shape_cast %2 : vector<1x8x32xf32> to vector<8x32xf32>
    %c0_5 = arith.constant 0 : index
    %c0_6 = arith.constant 0 : index
    %c0_7 = arith.constant 0 : index
    %4 = vector.load %arg3[%c0_5, %c0_6, %c0_7] : memref<1x8x32xf32, #tpu.memory_space<vmem>>, vector<1x8x32xf32>
    %5 = vector.shape_cast %4 : vector<1x8x32xf32> to vector<8x32xf32>
    %c0_8 = arith.constant 0 : index
    %c0_9 = arith.constant 0 : index
    %6 = vector.load %arg4[%c0_8, %c0_9] : memref<32x32xf32, #tpu.memory_space<vmem>>, vector<32x32xf32>
    %cst = arith.constant dense<0.000000e+00> : vector<8x32xf32>
    %7 = tpu.matmul %1, %6, %cst {dimension_numbers = #tpu.dot_dimension_numbers<[1], [0], [0], [1], [0, 0, 1, 1], [], []>} : vector<8x32xf32>, vector<32x32xf32>, vector<8x32xf32> -> vector<8x32xf32>
    %c0_10 = arith.constant 0 : index
    %c0_11 = arith.constant 0 : index
    %8 = vector.load %arg5[%c0_10, %c0_11] : memref<1x32xf32, #tpu.memory_space<vmem>>, vector<1x32xf32>
    %9 = vector.broadcast %8 : vector<1x32xf32> to vector<8x32xf32>
    %10 = arith.addf %7, %9 : vector<8x32xf32>
    %c0_12 = arith.constant 0 : index
    %c0_13 = arith.constant 0 : index
    %11 = vector.load %arg6[%c0_12, %c0_13] : memref<32x32xf32, #tpu.memory_space<vmem>>, vector<32x32xf32>
    %cst_14 = arith.constant dense<0.000000e+00> : vector<8x32xf32>
    %12 = tpu.matmul %3, %11, %cst_14 {dimension_numbers = #tpu.dot_dimension_numbers<[1], [0], [0], [1], [0, 0, 1, 1], [], []>} : vector<8x32xf32>, vector<32x32xf32>, vector<8x32xf32> -> vector<8x32xf32>
    %c0_15 = arith.constant 0 : index
    %c0_16 = arith.constant 0 : index
    %13 = vector.load %arg7[%c0_15, %c0_16] : memref<1x32xf32, #tpu.memory_space<vmem>>, vector<1x32xf32>
    %14 = vector.broadcast %13 : vector<1x32xf32> to vector<8x32xf32>
    %15 = arith.addf %12, %14 : vector<8x32xf32>
    %c0_17 = arith.constant 0 : index
    %c0_18 = arith.constant 0 : index
    %16 = vector.load %arg8[%c0_17, %c0_18] : memref<32x32xf32, #tpu.memory_space<vmem>>, vector<32x32xf32>
    %cst_19 = arith.constant dense<0.000000e+00> : vector<8x32xf32>
    %17 = tpu.matmul %5, %16, %cst_19 {dimension_numbers = #tpu.dot_dimension_numbers<[1], [0], [0], [1], [0, 0, 1, 1], [], []>} : vector<8x32xf32>, vector<32x32xf32>, vector<8x32xf32> -> vector<8x32xf32>
    %c0_20 = arith.constant 0 : index
    %c0_21 = arith.constant 0 : index
    %18 = vector.load %arg9[%c0_20, %c0_21] : memref<1x32xf32, #tpu.memory_space<vmem>>, vector<1x32xf32>
    %19 = vector.broadcast %18 : vector<1x32xf32> to vector<8x32xf32>
    %20 = arith.addf %17, %19 : vector<8x32xf32>
    %21 = vector.extract_strided_slice %10 {offsets = [0, 0], sizes = [8, 16], strides = [1, 1]} : vector<8x32xf32> to vector<8x16xf32>
    %22 = vector.shape_cast %21 : vector<8x16xf32> to vector<1x8x16xf32>
    %23 = vector.extract_strided_slice %15 {offsets = [0, 0], sizes = [8, 16], strides = [1, 1]} : vector<8x32xf32> to vector<8x16xf32>
    %24 = vector.shape_cast %23 : vector<8x16xf32> to vector<1x8x16xf32>
    %25 = vector.extract_strided_slice %20 {offsets = [0, 0], sizes = [8, 16], strides = [1, 1]} : vector<8x32xf32> to vector<8x16xf32>
    %26 = vector.shape_cast %25 : vector<8x16xf32> to vector<1x8x16xf32>
    "tpu.trace_start"() <{level = 10 : i32, message = "bqd,bkd->bqk"}> : () -> ()
    %cst_22 = arith.constant dense<0.000000e+00> : vector<1x8x8xf32>
    %27 = tpu.matmul %22, %24, %cst_22 {dimension_numbers = #tpu.dot_dimension_numbers<[2], [2], [1], [1], [0, 0, 0, 1, 1, 1], [0], [0]>} : vector<1x8x16xf32>, vector<1x8x16xf32>, vector<1x8x8xf32> -> vector<1x8x8xf32>
    "tpu.trace_stop"() : () -> ()
    %cst_23 = arith.constant dense<0xFF800000> : vector<1x8xf32>
    %28 = vector.multi_reduction <maximumf>, %27, %cst_23 [2] : vector<1x8x8xf32> to vector<1x8xf32>
    %29 = vector.shape_cast %28 : vector<1x8xf32> to vector<1x8x1xf32>
    %30 = vector.broadcast %29 : vector<1x8x1xf32> to vector<1x8x8xf32>
    %31 = arith.subf %27, %30 : vector<1x8x8xf32>
    %32 = math.exp %31 : vector<1x8x8xf32>
    %cst_24 = arith.constant dense<0.000000e+00> : vector<1x8xf32>
    %33 = vector.multi_reduction <add>, %32, %cst_24 [2] : vector<1x8x8xf32> to vector<1x8xf32>
    %34 = vector.shape_cast %33 : vector<1x8xf32> to vector<1x8x1xf32>
    %35 = tpu.reciprocal %34 {approx = true} : vector<1x8x1xf32> -> vector<1x8x1xf32>
    "tpu.trace_start"() <{level = 10 : i32, message = "bqk,bkd->bqd"}> : () -> ()
    %cst_25 = arith.constant dense<0.000000e+00> : vector<1x8x16xf32>
    %36 = tpu.matmul %32, %26, %cst_25 {dimension_numbers = #tpu.dot_dimension_numbers<[2], [1], [1], [2], [0, 0, 0, 1, 1, 2], [0], [0]>} : vector<1x8x8xf32>, vector<1x8x16xf32>, vector<1x8x16xf32> -> vector<1x8x16xf32>
    "tpu.trace_stop"() : () -> ()
    %37 = vector.broadcast %35 : vector<1x8x1xf32> to vector<1x8x16xf32>
    %38 = arith.mulf %36, %37 : vector<1x8x16xf32>
    %39 = vector.extract_strided_slice %10 {offsets = [0, 16], sizes = [8, 16], strides = [1, 1]} : vector<8x32xf32> to vector<8x16xf32>
    %40 = vector.shape_cast %39 : vector<8x16xf32> to vector<1x8x16xf32>
    %41 = vector.extract_strided_slice %15 {offsets = [0, 16], sizes = [8, 16], strides = [1, 1]} : vector<8x32xf32> to vector<8x16xf32>
    %42 = vector.shape_cast %41 : vector<8x16xf32> to vector<1x8x16xf32>
    %43 = vector.extract_strided_slice %20 {offsets = [0, 16], sizes = [8, 16], strides = [1, 1]} : vector<8x32xf32> to vector<8x16xf32>
    %44 = vector.shape_cast %43 : vector<8x16xf32> to vector<1x8x16xf32>
    "tpu.trace_start"() <{level = 10 : i32, message = "bqd,bkd->bqk"}> : () -> ()
    %cst_26 = arith.constant dense<0.000000e+00> : vector<1x8x8xf32>
    %45 = tpu.matmul %40, %42, %cst_26 {dimension_numbers = #tpu.dot_dimension_numbers<[2], [2], [1], [1], [0, 0, 0, 1, 1, 1], [0], [0]>} : vector<1x8x16xf32>, vector<1x8x16xf32>, vector<1x8x8xf32> -> vector<1x8x8xf32>
    "tpu.trace_stop"() : () -> ()
    %cst_27 = arith.constant dense<0xFF800000> : vector<1x8xf32>
    %46 = vector.multi_reduction <maximumf>, %45, %cst_27 [2] : vector<1x8x8xf32> to vector<1x8xf32>
    %47 = vector.shape_cast %46 : vector<1x8xf32> to vector<1x8x1xf32>
    %48 = vector.broadcast %47 : vector<1x8x1xf32> to vector<1x8x8xf32>
    %49 = arith.subf %45, %48 : vector<1x8x8xf32>
    %50 = math.exp %49 : vector<1x8x8xf32>
    %cst_28 = arith.constant dense<0.000000e+00> : vector<1x8xf32>
    %51 = vector.multi_reduction <add>, %50, %cst_28 [2] : vector<1x8x8xf32> to vector<1x8xf32>
    %52 = vector.shape_cast %51 : vector<1x8xf32> to vector<1x8x1xf32>
    %53 = tpu.reciprocal %52 {approx = true} : vector<1x8x1xf32> -> vector<1x8x1xf32>
    "tpu.trace_start"() <{level = 10 : i32, message = "bqk,bkd->bqd"}> : () -> ()
    %cst_29 = arith.constant dense<0.000000e+00> : vector<1x8x16xf32>
    %54 = tpu.matmul %50, %44, %cst_29 {dimension_numbers = #tpu.dot_dimension_numbers<[2], [1], [1], [2], [0, 0, 0, 1, 1, 2], [0], [0]>} : vector<1x8x8xf32>, vector<1x8x16xf32>, vector<1x8x16xf32> -> vector<1x8x16xf32>
    "tpu.trace_stop"() : () -> ()
    %55 = vector.broadcast %53 : vector<1x8x1xf32> to vector<1x8x16xf32>
    %56 = arith.mulf %54, %55 : vector<1x8x16xf32>
    %57 = tpu.concatenate %38, %56 in 2 : vector<1x8x16xf32>, vector<1x8x16xf32> -> vector<1x8x32xf32>
    %58 = vector.shape_cast %57 : vector<1x8x32xf32> to vector<1x1x256xf32>
    %c0_30 = arith.constant 0 : index
    %c0_31 = arith.constant 0 : index
    %c0_32 = arith.constant 0 : index
    %59 = vector.load %arg10[%c0_30, %c0_31, %c0_32] : memref<1x1x256xf32, #tpu.memory_space<vmem>>, vector<1x1x256xf32>
    tpu.vector_store %arg10[%c0_30, %c0_31, %c0_32], %58 {strides = array<i32>} : memref<1x1x256xf32, #tpu.memory_space<vmem>>, vector<1x1x256xf32>,
    return
  }
  func.func @transform_0(%arg0: i32) -> (i32, i32, i32) {
    %c0_i32 = arith.constant 0 : i32
    %c0_i32_0 = arith.constant 0 : i32
    %c0_i32_1 = arith.constant 0 : i32
    return %arg0, %c0_i32, %c0_i32_0 : i32, i32, i32
  }
  func.func @transform_1(%arg0: i32) -> (i32, i32, i32) {
    %c0_i32 = arith.constant 0 : i32
    %c0_i32_0 = arith.constant 0 : i32
    %c0_i32_1 = arith.constant 0 : i32
    return %arg0, %c0_i32, %c0_i32_0 : i32, i32, i32
  }
  func.func @transform_2(%arg0: i32) -> (i32, i32, i32) {
    %c0_i32 = arith.constant 0 : i32
    %c0_i32_0 = arith.constant 0 : i32
    %c0_i32_1 = arith.constant 0 : i32
    return %arg0, %c0_i32, %c0_i32_0 : i32, i32, i32
  }
  func.func @transform_3(%arg0: i32) -> (i32, i32) {
    %c0_i32 = arith.constant 0 : i32
    %c0_i32_0 = arith.constant 0 : i32
    %c0_i32_1 = arith.constant 0 : i32
    return %c0_i32, %c0_i32_0 : i32, i32
  }
  func.func @transform_4(%arg0: i32) -> (i32, i32) {
    %c0_i32 = arith.constant 0 : i32
    %c0_i32_0 = arith.constant 0 : i32
    %c0_i32_1 = arith.constant 0 : i32
    return %c0_i32, %c0_i32_0 : i32, i32
  }
  func.func @transform_5(%arg0: i32) -> (i32, i32) {
    %c0_i32 = arith.constant 0 : i32
    %c0_i32_0 = arith.constant 0 : i32
    %c0_i32_1 = arith.constant 0 : i32
    return %c0_i32, %c0_i32_0 : i32, i32
  }
  func.func @transform_6(%arg0: i32) -> (i32, i32) {
    %c0_i32 = arith.constant 0 : i32
    %c0_i32_0 = arith.constant 0 : i32
    %c0_i32_1 = arith.constant 0 : i32
    return %c0_i32, %c0_i32_0 : i32, i32
  }
  func.func @transform_7(%arg0: i32) -> (i32, i32) {
    %c0_i32 = arith.constant 0 : i32
    %c0_i32_0 = arith.constant 0 : i32
    %c0_i32_1 = arith.constant 0 : i32
    return %c0_i32, %c0_i32_0 : i32, i32
  }
  func.func @transform_8(%arg0: i32) -> (i32, i32) {
    %c0_i32 = arith.constant 0 : i32
    %c0_i32_0 = arith.constant 0 : i32
    %c0_i32_1 = arith.constant 0 : i32
    return %c0_i32, %c0_i32_0 : i32, i32
  }
  func.func @transform_9(%arg0: i32) -> (i32, i32, i32) {
    %c0_i32 = arith.constant 0 : i32
    %c0_i32_0 = arith.constant 0 : i32
    %c0_i32_1 = arith.constant 0 : i32
    return %arg0, %c0_i32, %c0_i32_0 : i32, i32, i32
  }
}

</mosaic_0001>

<bundles_post_ra>
// kernel: tpu_custom_call.1
= control target key start
LH: loop header
LB: loop body
LE: loop exit
PB: predicated region body
PF: predicated region fallthrough
CT: control target
= control target key end

     0   :  { %s2268_s0 = inlined_call_operand.hbm [shape: f32[2,8,32], index: 0, kind: input, shape index: {}]   ;;  %s2269_s1 = inlined_call_operand.hbm [shape: f32[2,8,32], index: 1, kind: input, shape index: {}]   ;;  %s2270_s2 = inlined_call_operand.hbm [shape: f32[2,8,32], index: 2, kind: input, shape index: {}]   ;;  %s2271_s3 = inlined_call_operand.hbm [shape: f32[32,32], index: 3, kind: input, shape index: {}]   ;;  %s2272_s4 = inlined_call_operand.vmem [shape: f32[1,32], index: 4, kind: input, shape index: {}]   ;;  %s2273_s5 = inlined_call_operand.hbm [shape: f32[32,32], index: 5, kind: input, shape index: {}]   ;;  %s2274_s6 = inlined_call_operand.vmem [shape: f32[1,32], index: 6, kind: input, shape index: {}]   ;;  %s2275_s7 = inlined_call_operand.hbm [shape: f32[32,32], index: 7, kind: input, shape index: {}]   ;;  %s2276_s8 = inlined_call_operand.vmem [shape: f32[1,32], index: 8, kind: input, shape index: {}]   ;;  %s2277_s9 = inlined_call_operand.hbm [shape: f32[2,1,256], index: 9, kind: output, shape index: {}]  }
   0x1   :  { %2303 = sst [smem:[#allocation25_spill]] %s2269_s1 }
   0x2   :  { %2304 = sst [smem:[#allocation26_spill]] %s2271_s3 }
   0x3   :  { %2305 = sst [smem:[#allocation27_spill]] %s2276_s8 }
   0x4   :  { %2306 = sst [smem:[#allocation28_spill]] %s2277_s9 }
   0x5   :  { %14 = vsyncpa [#allocation3], 0 }
   0x6   :  { %16 = vsyncpa [#allocation3 + $0x1], 0 }
   0x7   :  { %17 = vsyncpa [#allocation6], 0 }
   0x8   :  { %19 = vsyncpa [#allocation6 + $0x1], 0 }
   0x9   :  { %20 = vsyncpa [#allocation9], 0 }
   0xa   :  { %21 = vsyncpa [#allocation12], 0 }
   0xb   :  { %22 = vsyncpa [#allocation4], 0 }
   0xc   :  { %24 = vsyncpa [#allocation4 + $0x1], 0  ;;  %s1877_s30 = smov 0   ;;  %s1879_s10 = smov 0  }
   0xd   :  { %s1881_s11 = smov 0   ;;  %s1883_s12 = smov 0  }
   0xe LB: > { %2307 = sst [smem:[#allocation19_spill]] %s1793_s30  ;;  %s1898_s13 = sadd.s32 4294967295, %s1805_s12   ;;  %s1805_s12 = sphi %s1883_s12, %s2347_s12   ;;  %s1801_s11 = sphi %s1881_s11, %s2351_s11   ;;  %s1797_s10 = sphi %s1879_s10, %s2350_s10   ;;  %s1793_s30 = sphi %s1877_s30, %s2349_s30  }
   0xf   : > { %2308 = sst [smem:[#allocation20_spill]] %s1805_s12  ;;  %s1313_s14 = sadd.s32 4294967294, %s1805_s12  }
  0x10   : > { %p50_p0 = scmp.ne.s32.totalorder %s1797_s10, %s1793_s30  ;;  %p2278_p1 = scmp.eq.s32.totalorder %s1898_s13, 0 }
  0x11   : > { %p258_p3 = scmp.eq.s32.totalorder %s1313_s14, 1  ;;  %p1314_p5 = scmp.ge.s32.totalorder %s1805_s12, 1 }
  0x12   : > { %p1907_p4 = por %p2278_p1, %p50_p0  ;;  %p265_p7 = scmp.lt.s32.totalorder %s1805_s12, 3 }
  0x13   : > { %p1912_p6 = por %p258_p3, %p50_p0  ;;  %s1807_s18 = smov [#allocation8]  }
  0x14   : > { %s2309_s15 = scalar_select %p1907_p4, 1, 0 }
  0x15   : > { %s2310_s16 = scalar_select %p1912_p6, 1, 0 }
  0x16   : > { %p1917_p8 = pnand %p1314_p5, %p265_p7  ;;  %s277_s19 = sshll.u32 %s1807_s18, 4  ;;  %s1921_s19 = int_to_ptr.vmem [resolvable:$true] %s277_s19 }
  0x17   : > { %2311 = sst [smem:[#allocation21_spill]] %s2310_s16  ;;  %s1933_s21 = sadd.s32 1, %s1805_s12  }
  0x18   : > { %s2312_s17 = scalar_select %p1917_p8, 1, 0 }
  0x19   : > { %p1465_p9 = pneg %p1917_p8  ;;  %2314 = sst [smem:[#allocation22_spill]] %s1933_s21 }
  0x1a   : > { %s37_s22 = sadd.s32 1, %s1801_s11  ;;  %s34_s23 = ssub.s32 %s1805_s12, %s1933_s21 }
  0x1b   : > { %p1928_p11 = pnand %p1465_p9, %p2278_p1  ;;  %s2315_s3 = sld [smem:[#allocation26_spill]] }
  0x1d   : > { %s2313_s20 = scalar_select %p1928_p11, 1, 0 }
  0x1e   : > { %p1946_p13 = pneg %p1928_p11 }
  0x20   : > { %s2316_s29 = scalar_select %p1946_p13, 1, 0 }
  0x21   : > { %s1553_s26 = scalar_lea.hbm %s2315_s3, 512 }
  0x22   : > { %p1554_p12 = scmp.ne.s32.totalorder %s2315_s3, %s1553_s26  ;;  %p1560_p5 = scmp.lt.u32.totalorder %s1553_s26, %s2315_s3 }
  0x24   : > { %p1556_p0 = pnand %p1946_p13, %p1554_p12 }
  0x26   : > { %p1557_p3 = pneg %p1556_p0 }
  0x28   : > { %p1562_p7 = pnand %p1560_p5, %p1557_p3 }
  0x2a   : > { %1565 = shalt.err (!%p1562_p7)
}
  0x2b   : > { %s1566_s24 = scalar_lea.vmem %s1921_s19, 512  ;;  %p1574_p2 = scmp.lt.s32.totalorder %s1921_s19, %s1921_s19 }
  0x2c   : > { %p1567_p9 = scmp.ne.s32.totalorder %s1921_s19, %s1566_s24  ;;  %p1575_p6 = scmp.lt.s32.totalorder %s1566_s24, %s1566_s24 }
  0x2e   : > { %p1569_p10 = pnand %p1567_p9, %p1946_p13  ;;  %p1576_p12 = por %p1575_p6, %p1574_p2 }
  0x30   : > { %p1570_p1 = pneg %p1569_p10 }
  0x32   : > { %p1577_p0 = pnand %p1576_p12, %p1570_p1 }
  0x34   : > { %1580 = shalt.err (!%p1577_p0)
}
  0x35   : > { %s2282_s25 = smov 128   ;;  %s2284_s26 = smov 8  }
  0x36   : > { %1468 = dma.hbm_to_vmem [thread:$0]  (!%p1928_p11), %s2315_s3, 512, %s1921_s19, [#allocation9], %s2282_s25, %s2282_s25, %s2284_s26  }
  0x37   : > { %p35_p1 = scmp.eq.s32.totalorder %s34_s23, 0  ;;  %p44_p2 = scmp.ne.s32.totalorder %s1801_s11, %s1797_s10 }
  0x38   : > { %p45_p6 = scmp.eq.s32.totalorder %s1805_s12, 0  ;;  %p1492_p10 = scmp.lt.s32.totalorder %s1805_s12, 2 }
  0x39   : > { %s1975_s14 = scalar_select %p35_p1, %s1801_s11, %s37_s22  }
  0x3a   : > { %p46_p3 = por %p45_p6, %p44_p2  ;;  %p2318_p5 = scmp.eq.s32.totalorder %s1898_s13, 1 }
  0x3b   : > { %2317 = sst [smem:[#allocation23_spill]] %s1975_s14  ;;  %s2286_s24 = sand.u32 1, %s1801_s11  }
  0x3c   : > { %p1979_p7 = por %p2318_p5, %p44_p2  ;;  %s1985_s21 = sshll.u32 %s1805_s12, 7 }
  0x3d   : > { %s1989_s16 = sshll.u32 %s2286_s24, 3  ;;  %p1991_p9 = pnand %p1492_p10, %p46_p3 }
  0x3e   : > { %s2319_s18 = scalar_select %p1979_p7, 1, 0 }
  0x3f   : > { %s2321_s19 = scalar_select %p1991_p9, 1, 0 }
  0x40   : > { %2320 = sst [smem:[#allocation24_spill]] %s2319_s18  ;;  %s344_s22 = sand.u32 1, %s1805_s12  }
  0x41   : > { %s2322_s1 = sld [smem:[#allocation25_spill]]  ;;  %s348_s25 = scalar_lea.vmem [#allocation5], %s1989_s16 }
  0x42   : > { %s355_s26 = sshll.u32 %s348_s25, 4  ;;  %s2005_s24 = scalar_lea.sflag [#allocation6], %s344_s22  ;;  %s2003_s26 = int_to_ptr.vmem [resolvable:$true] %s355_s26 }
  0x43   : > { %p2011_p0 = pneg %p1991_p9 }
  0x45   : > { %s2323_s14 = scalar_select %p2011_p0, 1, 0 }
  0x47   : > { %s2000_s28 = scalar_lea.hbm %s2322_s1, %s1985_s21  ;;  %s1586_s12 = scalar_lea.hbm %s2322_s1, 256 }
  0x48   : > { %s1581_s3 = scalar_lea.hbm %s2000_s28, 128  ;;  %p1587_p6 = scmp.lt.u32.totalorder %s2000_s28, %s2322_s1 }
  0x49   : > { %p1582_p12 = scmp.ne.s32.totalorder %s2000_s28, %s1581_s3  ;;  %p1588_p10 = scmp.lt.u32.totalorder %s1586_s12, %s1581_s3 }
  0x4a   : > { %p1590_p5 = scmp.lt.u32.totalorder %s1581_s3, %s2000_s28 }
  0x4b   : > { %p1584_p1 = pnand %p2011_p0, %p1582_p12  ;;  %p1589_p3 = por %p1588_p10, %p1587_p6 }
  0x4d   : > { %p1585_p2 = pneg %p1584_p1  ;;  %p1591_p7 = por %p1590_p5, %p1589_p3 }
  0x4f   : > { %p1592_p4 = pnand %p1591_p7, %p1585_p2 }
  0x51   : > { %1595 = shalt.err (!%p1592_p4)
}
  0x52   : > { %s1596_s22 = scalar_lea.vmem %s2003_s26, 128  ;;  %s1810_s23 = smov [#allocation5]  }
  0x53   : > { %p1597_p12 = scmp.ne.s32.totalorder %s2003_s26, %s1596_s22  ;;  %s1601_s27 = sshll.u32 %s1810_s23, 4  ;;  %s1602_s27 = int_to_ptr.vmem [resolvable:$false] %s1601_s27 }
  0x54   : > { %s1603_s30 = scalar_lea.vmem %s1602_s27, 256  ;;  %p1604_p11 = scmp.lt.s32.totalorder %s2003_s26, %s1602_s27 }
  0x55   : > { %p1599_p1 = pnand %p1597_p12, %p2011_p0  ;;  %p1605_p13 = scmp.lt.s32.totalorder %s1603_s30, %s1596_s22 }
  0x57   : > { %p1600_p8 = pneg %p1599_p1  ;;  %p1606_p6 = por %p1605_p13, %p1604_p11 }
  0x59   : > { %p1607_p10 = pnand %p1606_p6, %p1600_p8 }
  0x5b   : > { %1610 = shalt.err (!%p1607_p10)
}
  0x5c   : > { %1481 = dma.hbm_to_vmem [thread:$0]  (!%p1991_p9), %s2000_s28, 128, %s2003_s26, %s2005_s24  }
  0x5d   : > { %s1811_s3 = smov [#allocation10]   ;;  %s1812_s25 = smov [#allocation11]  }
  0x5e   : > { %s293_s12 = sshll.u32 %s1811_s3, 4  ;;  %s309_s1 = sshll.u32 %s1812_s25, 4  ;;  %s294_s12 = int_to_ptr.vmem [resolvable:$true] %s293_s12  ;;  %s310_s1 = int_to_ptr.vmem [resolvable:$true] %s309_s1 }
  0x5f   : > { %s1611_s27 = scalar_lea.hbm %s2273_s5, 512  ;;  %p2324_p8 = scmp.ne.s32.totalorder %s2316_s29, 0 }
  0x60   : > { %p1612_p4 = scmp.ne.s32.totalorder %s2273_s5, %s1611_s27  ;;  %p1618_p7 = scmp.lt.u32.totalorder %s1611_s27, %s2273_s5 }
  0x62   : > { %p1614_p11 = pnand %p1612_p4, %p2324_p8 }
  0x64   : > { %p1615_p13 = pneg %p1614_p11 }
  0x66   : > { %p1620_p2 = pnand %p1618_p7, %p1615_p13 }
  0x68   : > { %1623 = shalt.err (!%p1620_p2)
}
  0x69   : > { %s1624_s26 = scalar_lea.vmem %s294_s12, 512  ;;  %p1632_p1 = scmp.lt.s32.totalorder %s294_s12, %s294_s12 }
  0x6a   : > { %p1625_p3 = scmp.ne.s32.totalorder %s294_s12, %s1624_s26  ;;  %p1633_p6 = scmp.lt.s32.totalorder %s1624_s26, %s1624_s26 }
  0x6c   : > { %p1627_p5 = pnand %p1625_p3, %p2324_p8  ;;  %p1634_p10 = por %p1633_p6, %p1632_p1 }
  0x6e   : > { %p1628_p12 = pneg %p1627_p5 }
  0x70   : > { %p1635_p9 = pnand %p1634_p10, %p1628_p12 }
  0x72   : > { %1638 = shalt.err (!%p1635_p9)
}
  0x73   : > { %p2325_p4 = scmp.ne.s32.totalorder %s2313_s20, 0  ;;  %s2326_s9 = smov 8  }
  0x74   : > { %s2327_s28 = smov 128   ;;  %s1639_s23 = scalar_lea.hbm %s2275_s7, 512 }
  0x75   : > { %1471 = dma.hbm_to_vmem [thread:$0]  (!%p2325_p4), %s2273_s5, 512, %s294_s12, [#allocation9], %s2327_s28, %s2327_s28, %s2326_s9  }
  0x76   : > { %p1640_p11 = scmp.ne.s32.totalorder %s2275_s7, %s1639_s23  ;;  %p1646_p7 = scmp.lt.u32.totalorder %s1639_s23, %s2275_s7 }
  0x78   : > { %p1642_p9 = pnand %p1640_p11, %p2324_p8 }
  0x7a   : > { %p1643_p13 = pneg %p1642_p9 }
  0x7c   : > { %p1648_p2 = pnand %p1646_p7, %p1643_p13 }
  0x7e   : > { %1651 = shalt.err (!%p1648_p2)
}
  0x7f   : > { %s1652_s8 = scalar_lea.vmem %s310_s1, 512  ;;  %p1660_p1 = scmp.lt.s32.totalorder %s310_s1, %s310_s1 }
  0x80   : > { %p1653_p3 = scmp.ne.s32.totalorder %s310_s1, %s1652_s8  ;;  %p1661_p6 = scmp.lt.s32.totalorder %s1652_s8, %s1652_s8 }
  0x82   : > { %p1655_p5 = pnand %p1653_p3, %p2324_p8  ;;  %p1662_p10 = por %p1661_p6, %p1660_p1 }
  0x84   : > { %p1656_p12 = pneg %p1655_p5 }
  0x86   : > { %p1663_p0 = pnand %p1662_p10, %p1656_p12 }
  0x88   : > { %1666 = shalt.err (!%p1663_p0)
}
  0x89   : > { %1474 = dma.hbm_to_vmem [thread:$0]  (!%p2325_p4), %s2275_s7, 512, %s310_s1, [#allocation12], %s2327_s28, %s2327_s28, %s2326_s9  }
  0x8a   : > { %s2081_s25 = scalar_lea.hbm %s2268_s0, %s1985_s21  ;;  %s330_s20 = scalar_lea.vmem [#allocation2], %s1989_s16 }
  0x8b   : > { %s337_s23 = sshll.u32 %s330_s20, 4  ;;  %s2090_s30 = scalar_lea.hbm %s2270_s2, %s1985_s21  ;;  %s2084_s23 = int_to_ptr.vmem [resolvable:$true] %s337_s23 }
  0x8c   : > { %s2328_s26 = sand.u32 1, %s1801_s11   ;;  %s1667_s9 = scalar_lea.hbm %s2081_s25, 128 }
  0x8d   : > { %s327_s1 = scalar_lea.sflag [#allocation3], %s2328_s26  ;;  %p1668_p0 = scmp.ne.s32.totalorder %s2081_s25, %s1667_s9 }
  0x8e   : > { %p2329_p8 = scmp.ne.s32.totalorder %s2323_s14, 0  ;;  %s1672_s12 = scalar_lea.hbm %s2268_s0, 256 }
  0x8f   : > { %p1673_p9 = scmp.lt.u32.totalorder %s2081_s25, %s2268_s0  ;;  %p1674_p13 = scmp.lt.u32.totalorder %s1672_s12, %s1667_s9 }
  0x90   : > { %p1670_p4 = pnand %p1668_p0, %p2329_p8  ;;  %p1676_p2 = scmp.lt.u32.totalorder %s1667_s9, %s2081_s25 }
  0x91   : > { %p1675_p7 = por %p1674_p13, %p1673_p9 }
  0x92   : > { %p1671_p11 = pneg %p1670_p4 }
  0x93   : > { %p1677_p3 = por %p1676_p2, %p1675_p7 }
  0x95   : > { %p1678_p5 = pnand %p1677_p3, %p1671_p11 }
  0x97   : > { %1681 = shalt.err (!%p1678_p5)
}
  0x98   : > { %s1682_s21 = scalar_lea.vmem %s2084_s23, 128  ;;  %s1813_s3 = smov [#allocation2]  }
  0x99   : > { %p1683_p12 = scmp.ne.s32.totalorder %s2084_s23, %s1682_s21  ;;  %s1687_s20 = sshll.u32 %s1813_s3, 4  ;;  %s1688_s20 = int_to_ptr.vmem [resolvable:$false] %s1687_s20 }
  0x9a   : > { %s1689_s27 = scalar_lea.vmem %s1688_s20, 256  ;;  %p1690_p10 = scmp.lt.s32.totalorder %s2084_s23, %s1688_s20 }
  0x9b   : > { %p1685_p1 = pnand %p1683_p12, %p2329_p8  ;;  %p1691_p0 = scmp.lt.s32.totalorder %s1689_s27, %s1682_s21 }
  0x9d   : > { %p1686_p6 = pneg %p1685_p1  ;;  %p1692_p4 = por %p1691_p0, %p1690_p10 }
  0x9f   : > { %p1693_p9 = pnand %p1692_p4, %p1686_p6 }
  0xa1   : > { %1696 = shalt.err (!%p1693_p9)
}
  0xa2   : > { %p2330_p11 = scmp.ne.s32.totalorder %s2321_s19, 0  ;;  %s366_s22 = scalar_lea.vmem [#allocation7], %s1989_s16 }
  0xa3   : > { %s373_s26 = sshll.u32 %s366_s22, 4  ;;  %s1697_s9 = scalar_lea.hbm %s2090_s30, 128  ;;  %s374_s26 = int_to_ptr.vmem [resolvable:$true] %s373_s26 }
  0xa4   : > { %1478 = dma.hbm_to_vmem [thread:$0]  (!%p2330_p11), %s2081_s25, 128, %s2084_s23, %s327_s1  }
  0xa5   : > { %p1698_p13 = scmp.ne.s32.totalorder %s2090_s30, %s1697_s9  ;;  %s1702_s12 = scalar_lea.hbm %s2270_s2, 256 }
  0xa6   : > { %p1703_p3 = scmp.lt.u32.totalorder %s2090_s30, %s2270_s2  ;;  %p1704_p5 = scmp.lt.u32.totalorder %s1702_s12, %s1697_s9 }
  0xa7   : > { %p1700_p7 = pnand %p1698_p13, %p2329_p8  ;;  %p1706_p1 = scmp.lt.u32.totalorder %s1697_s9, %s2090_s30 }
  0xa8   : > { %p1705_p12 = por %p1704_p5, %p1703_p3 }
  0xa9   : > { %p1701_p2 = pneg %p1700_p7 }
  0xaa   : > { %p1707_p6 = por %p1706_p1, %p1705_p12 }
  0xac   : > { %p1708_p10 = pnand %p1707_p6, %p1701_p2 }
  0xae   : > { %1711 = shalt.err (!%p1708_p10)
}
  0xaf   : > { %s1712_s16 = scalar_lea.vmem %s374_s26, 128  ;;  %s1814_s25 = smov [#allocation7]  }
  0xb0   : > { %p1713_p0 = scmp.ne.s32.totalorder %s374_s26, %s1712_s16  ;;  %s1717_s23 = sshll.u32 %s1814_s25, 4  ;;  %s1718_s23 = int_to_ptr.vmem [resolvable:$false] %s1717_s23 }
  0xb1   : > { %s1719_s1 = scalar_lea.vmem %s1718_s23, 256  ;;  %p1720_p13 = scmp.lt.s32.totalorder %s374_s26, %s1718_s23 }
  0xb2   : > { %p1715_p4 = pnand %p1713_p0, %p2329_p8  ;;  %p1721_p7 = scmp.lt.s32.totalorder %s1719_s1, %s1712_s16 }
  0xb4   : > { %p1716_p9 = pneg %p1715_p4  ;;  %p1722_p11 = por %p1721_p7, %p1720_p13 }
  0xb6   : > { %p1723_p3 = pnand %p1722_p11, %p1716_p9 }
  0xb8   : > { %1726 = shalt.err (!%p1723_p3)
}
  0xb9   : > { %p2331_p5 = scmp.ne.s32.totalorder %s2321_s19, 0  ;;  %p2332_p2 = scmp.ne.s32.totalorder %s2312_s17, 0 }
  0xba   : > { %s2137_s14 = sand.u32 (!%p2332_p2), 1, %s1797_s10   ;;  %p2333_p8 = scmp.ne.s32.totalorder (!%p2332_p2), %s2309_s15, 0 }
  0xbb   : > { %1484 = dma.hbm_to_vmem [thread:$0]  (!%p2331_p5), %s2090_s30, 128, %s374_s26, %s2005_s24  }
  0xbc   : > { %382 = sbr.rel (%p2332_p2) target bundleno = 1406 (0x57e), region = 56  ;;  %s2140_s21 = sshll.u32 (!%p2332_p2), %s2137_s14, 3 }
  0xbd   : > { %s385_s3 = scalar_lea.sflag (!%p2332_p2), [#allocation3], %s2137_s14  ;;  %s388_s20 = scalar_lea.vmem (!%p2332_p2), [#allocation2], %s2140_s21 }
  0xc3   : > { %1772 = dma.done.wait (%p2333_p8), %s385_s3, 128  }
  0xc4   : > { %1774 = vsyncadd (%p2333_p8), %s385_s3, 4294967168  ;;  %s393_s17 = sand.u32 1, %s1898_s13   ;;  %s397_s19 = scalar_lea.vmem [#allocation5], %s2140_s21 }
  0xc5   : > { %s394_s24 = scalar_lea.sflag [#allocation6], %s393_s17 }
  0xc6   : > { %1776 = dma.done.wait (%p2333_p8), %s394_s24, 256  }
  0xc7   : > { %1778 = vsyncadd (%p2333_p8), %s394_s24, 4294967040  ;;  %s406_s30 = scalar_lea.vmem [#allocation7], %s2140_s21  ;;  %p2334_p11 = scmp.eq.s32.totalorder %s1898_s13, 0 }
  0xc9   : > { %1780 = dma.done.wait (%p2334_p11), [#allocation9], 1024   ;;  %p2335_p12 = pmov %p2334_p11 }
  0xca   : > { %p2336_p1 = pmov %p2334_p11 }
  0xcb   : > { %1782 = vsyncadd (%p2335_p12), [#allocation9], 4294966272 }
  0xcc   : > { %1784 = dma.done.wait (%p2336_p1), [#allocation12], 512   ;;  %p2337_p6 = pmov %p2336_p1 }
  0xcd   : > { %v1815_v0 = vmov 0.0|0.0   ;;  %vm1816_vm0 = vmmov 0   ;;  %v1817_v1 = vmov 0.0   ;;  %v551_v2 = vld [vmem:[#allocation10] sm:$0xff]  ;;  %v552_v3 = vld [vmem:[#allocation10 + $0x8] sm:$0xff]  ;;  %v553_v7 = vld [vmem:[#allocation10 + $0x10] sm:$0xff] }
  0xce   : > { %1786 = vsyncadd (%p2337_p6), [#allocation12], 4294966784  ;;  %1433 = vmatprep.subr.bf16.mxu1 %v1815_v0  ;;  %1427 = vmatprep.subr.bf16.mxu0 %v1815_v0  ;;  %v466_v4 = vld [vmem:[#allocation8] sm:$0xff]  ;;  %v1434_v5 = vpack.c.bf16 %v552_v3, %v551_v2  ;;  %v467_v6 = vld [vmem:[#allocation8 + $0x8] sm:$0xff]  ;;  %vm477_vm1 = vcmask 261120   ;;  %vm719_vm2 = vcmask 130048  }
  0xcf   : > { %1393 = vmatprep.mubr.msk.f32.mxu1 %vm1816_vm0, %v1817_v1  ;;  %1382 = vmatprep.mubr.msk.f32.mxu0 %vm1816_vm0, %v1817_v1  ;;  %v554_v8 = vld [vmem:[#allocation10 + $0x18] sm:$0xff]  ;;  %v1428_v9 = vpack.c.bf16 %v467_v6, %v466_v4  ;;  %v468_v10 = vld [vmem:[#allocation8 + $0x10] sm:$0xff]  ;;  %v464_v14 = vld [vmem:[%s397_s19] sm:$0xff]  ;;  %s1818_s9 = smov 112   ;;  %s2338_s12 = sld [smem:[#allocation27_spill]]  ;;  %vm796_vm3 = vcmask 64512  }
  0xd0   : > { %v469_v11 = vld [vmem:[#allocation8 + $0x18] sm:$0xff]  ;;  %1435 = vmatpush3.bf16.msra.mxu1 %v1434_v5  ;;  %v1437_v12 = vpack.c.bf16 %v554_v8, %v553_v7  ;;  %v635_v16 = vld [vmem:[#allocation11] sm:$0xff]  ;;  %v636_v17 = vld [vmem:[#allocation11 + $0x8] sm:$0xff]  ;;  %s1819_s18 = smov 16   ;;  %v1820_v62 = vmov 1983009808  }
  0xd1   : > { %1429 = vmatpush3.bf16.msra.mxu0 %v1428_v9  ;;  %1436 = vmatprep.subr.bf16.mxu1 %v1815_v0  ;;  %v1431_v13 = vpack.c.bf16 %v469_v11, %v468_v10  ;;  %v463_v15 = vld [vmem:[%s388_s20] sm:$0xff]  ;;  %v1440_v19 = vpack.c.bf16 %v636_v17, %v635_v16  ;;  %v1054_v63 = vunpack.c.l.s4 %v1820_v62  ;;  %v1821_v2 = vmov 1934713408   ;;  %s1822_s29 = smov 32   ;;  %s1823_s16 = smov 96  }
  0xd2   : > { %1430 = vmatprep.subr.bf16.mxu0 %v1815_v0  ;;  %v637_v18 = vld [vmem:[#allocation11 + $0x10] sm:$0xff]  ;;  %v638_v20 = vld [vmem:[#allocation11 + $0x18] sm:$0xff]  ;;  %v1069_v3 = vunpack.c.l.s4 %v1821_v2  ;;  %s1824_s25 = smov 64   ;;  %vm1126_vm4 = vcmask 523264   ;;  %s1332_s23 = sshll.u32 %s2137_s14, 1  ;;  %vm1128_vm5 = vcmask 785408  }
  0xd3   : > { %v1443_v21 = vpack.c.bf16 %v638_v20, %v637_v18  ;;  %v465_v22 = vld [vmem:[%s406_s30] sm:$0xff]  ;;  %v1055_v4 = vunpack.c.0.s8 %v1054_v63  ;;  %s2339_s1 = sld [smem:[#allocation24_spill]]  ;;  %s1350_s21 = sshll.u32 %s1898_s13, 5 }
  0xd4   : > { %1438 = vmatpush3.bf16.msra.mxu1 %v1437_v12  ;;  %v1335_v23 = vld [vmem:[%s2274_s6] ss:$0 sm:$0xff]  ;;  %v1070_v6 = vunpack.c.0.s8 %v1069_v3  ;;  %s462_s3 = scalar_lea.vmem [#allocation13], %s1332_s23  ;;  %s2340_s19 = sld [smem:[#allocation28_spill]] }
  0xd5   : > { %1432 = vmatpush3.bf16.msra.mxu0 %v1431_v13  ;;  %1407 = vmatprep.subr.mxu1 %v1817_v1  ;;  %v1333_v24 = vld [vmem:[%s2272_s4] ss:$0 sm:$0xff]  ;;  %s1171_s20 = sshll.u32 %s462_s3, 4  ;;  %s1157_s15 = scalar_lea.sflag [#allocation4], %s2137_s14  ;;  %s2226_s20 = int_to_ptr.vmem [resolvable:$true] %s1171_s20 }
  0xd6   : > { %1439 = vmatprep.subr.bf16.mxu0 %v1815_v0  ;;  %v1337_v33 = vld [vmem:[%s2338_s12] ss:$0 sm:$0xff]  ;;  %s1727_s27 = scalar_lea.vmem %s2226_s20, 32  ;;  %s1826_s13 = smov [#allocation13]  }
  0xd7   : > { %1394 = vmatmul.mubr.msk.f32.vlgmr.msra.gmra.mrb[0].mxu1 %vm477_vm1, %v464_v14  ;;  %p1728_p10 = scmp.ne.s32.totalorder %s2226_s20, %s1727_s27  ;;  %s1731_s22 = sshll.u32 %s1826_s13, 4  ;;  %s1732_s22 = int_to_ptr.vmem [resolvable:$false] %s1731_s22 }
  0xd8   : > { %1383 = vmatmul.mubr.msk.f32.vlgmr.msra.gmra.mrb[0].mxu0 %vm477_vm1, %v463_v15  ;;  %1409 = vmatprep.mubr.msk.f32.mxu1 %vm1816_vm0, %v1817_v1  ;;  %s1733_s26 = scalar_lea.vmem %s1732_s22, 64  ;;  %p1734_p13 = scmp.lt.s32.totalorder %s2226_s20, %s1732_s22 }
  0xd9   : > { %1404 = vmatprep.mubr.msk.f32.mxu0 %vm1816_vm0, %v1817_v1  ;;  %1441 = vmatpush3.bf16.msra.mxu0 %v1440_v19  ;;  %p2341_p0 = scmp.ne.s32.totalorder %s2339_s1, 0  ;;  %p1735_p7 = scmp.lt.s32.totalorder %s1733_s26, %s1727_s27 }
  0xda   : > { %1442 = vmatprep.subr.bf16.mxu0 %v1815_v0  ;;  %v1056_v0 = vlaneseq  ;;  %s2224_s30 = scalar_lea.hbm %s2340_s19, %s1350_s21 }
  0xdb   : > { %p1729_p4 = pnand %p1728_p10, %p2341_p0  ;;  %p1736_p3 = por %p1735_p7, %p1734_p13 }
  0xdc   : > { %v1057_v5 = vshrl.u32 %v1056_v0, 7  ;;  %vm1153_vm6 = vcmp.lt.s32.totalorder %v1056_v0, 256 }
  0xdd   : > { %1444 = vmatpush3.bf16.msra.mxu0 %v1443_v21  ;;  %p1730_p9 = pneg %p1729_p4 }
  0xde   : > { %1417 = vmatprep.subr.mxu0 %v1817_v1  ;;  %v1058_v8 = vsub.s32 %v1055_v4, %v1057_v5  ;;  %v1073_v10 = vsub.s32 %v1070_v6, %v1057_v5 }
  0xdf   : > { %p1737_p5 = pnand %p1736_p3, %p1730_p9 }
  0xe0   : > { %1405 = vmatmul.mubr.msk.f32.vlgmr.msra.gmra.mrb[2].mxu0 %vm477_vm1, %v465_v22 }
  0xe1   : > { %1419 = vmatprep.mubr.msk.f32.mxu0 %vm1816_vm0, %v1817_v1 }
 0x1aa   : > { %v631_v25 = vpop.f32.mrb[0].mxu1 }
 0x1ab   : > { %v632_v26 = vadd.f32 %v1335_v23, %v631_v25  ;;  %v1395_v27 = vpop.f32.mrb[1].mxu1  ;;  %v547_v28 = vpop.f32.mrb[0].mxu0 }
 0x1ac   : > { %v548_v29 = vadd.f32 %v1333_v24, %v547_v28  ;;  %v1384_v30 = vpop.f32.mrb[1].mxu0 }
 0x1ad   : > { %883 = vrot.lane.b32.xlu0 %v632_v26, %s1818_s9  ;;  %1408 = vmatpush3.xpose.msk.msra.mxu1 %vm719_vm2, %v632_v26 }
 0x1ae   : > { %1412 = vmatprep.subr.mxu1 %v1817_v1 }
 0x1b0   : > { %1410 = vmatmul.mubr.msk.f32.vlgmr.msra.gmra.mrb[2].mxu1 %vm719_vm2, %v548_v29 }
 0x1b1   : > { %881 = vrot.lane.b32.xlu0 %v548_v29, %s1818_s9  ;;  %1414 = vmatprep.mubr.msk.f32.mxu1 %vm1816_vm0, %v1817_v1  ;;  %v1825_v29 = vmov 1966171168  }
 0x1b2   : > { %v1137_v30 = vunpack.c.l.s4 %v1825_v29 }
 0x1b3   : > { %v715_v34 = vpop.f32.mrb[2].mxu0 }
 0x1b4   : > { %v716_v35 = vadd.f32 %v1337_v33, %v715_v34  ;;  %v1406_v36 = vpop.f32.mrb[3].mxu0 }
 0x1b6   : > { %970 = vrot.lane.b32.xlu0 %v716_v35, %s1818_s9  ;;  %1413 = vmatpush3.msra.mxu1 %v716_v35 }
 0x1b7   : > { %1422 = vmatprep.subr.mxu1 %v1817_v1 }
 0x21f   : > { %v884_v31 = vpop.permute.xlu0 %883 }
 0x220   : > { %1418 = vmatpush3.xpose.msk.msra.mxu0 %vm719_vm2, %v884_v31 }
 0x223   : > { %v882_v32 = vpop.permute.xlu0 %881 }
 0x224   : > { %1420 = vmatmul.mubr.msk.f32.vlgmr.msra.gmra.mrb[4].mxu0 %vm719_vm2, %v882_v32  ;;  %v1138_v32 = vunpack.c.0.s8 %v1137_v30 }
 0x228   : > { %v971_v46 = vpop.permute.xlu0 %970 }
 0x283   : > { %v792_v37 = vpop.f32.mrb[2].mxu1 }
 0x284   : > { %v1411_v38 = vpop.f32.mrb[3].mxu1  ;;  %v797_v39 = vsel %vm796_vm3, %v792_v37, -inf }
 0x285   : > { %798 = vmax.xlane.f32.xlu1 %v797_v39 }
 0x2f7   : > { %v955_v40 = vpop.f32.mrb[4].mxu0 }
 0x2f8   : > { %v1421_v41 = vpop.f32.mrb[5].mxu0  ;;  %v959_v42 = vsel %vm796_vm3, %v955_v40, -inf }
 0x2f9   : > { %960 = vmax.xlane.f32.xlu1 %v959_v42 }
 0x312   : > { %v799_v43 = vpop.xlane.xlu1 %798 }
 0x313   : > { %v800_v44 = vsub.f32 %v792_v37, %v799_v43  ;;  %v1141_v37 = vsub.s32 %v1138_v32, %v1057_v5 }
 0x315   : > { %v801_v45 = vmul.f32 1.442695, %v800_v44 }
 0x317   : > { %1545 = vpow2.f32 %v801_v45 }
 0x321   : > { %v1546_v47 = vpop.eup %1545 }
 0x322   : > { %1415 = vmatmul.mubr.msk.f32.vlgmr.msra.gmra.mrb[4].mxu1 %vm796_vm3, %v1546_v47  ;;  %v803_v48 = vsel %vm796_vm3, %v1546_v47, 0.0 }
 0x323   : > { %804 = vadd.xlane.f32.xlu0 %v803_v48  ;;  %1423 = vmatpush3.msra.mxu1 %v971_v46 }
 0x324   : > { %1424 = vmatprep.mubr.msk.f32.mxu1 %vm1816_vm0, %v1817_v1 }
 0x386   : > { %v961_v49 = vpop.xlane.xlu1 %960 }
 0x387   : > { %v962_v50 = vsub.f32 %v955_v40, %v961_v49 }
 0x389   : > { %v963_v51 = vmul.f32 1.442695, %v962_v50 }
 0x38b   : > { %1547 = vpow2.f32 %v963_v51 }
 0x395   : > { %v1548_v52 = vpop.eup %1547 }
 0x396   : > { %1425 = vmatmul.mubr.msk.f32.vlgmr.msra.gmra.mrb[6].mxu1 %vm796_vm3, %v1548_v52  ;;  %v965_v53 = vsel %vm796_vm3, %v1548_v52, 0.0 }
 0x397   : > { %966 = vadd.xlane.f32.xlu1 %v965_v53 }
 0x3b0   : > { %v805_v61 = vpop.xlane.xlu0 %804 }
 0x3f5   : > { %v876_v54 = vpop.f32.mrb[4].mxu1 }
 0x3f6   : > { %v1416_v55 = vpop.f32.mrb[5].mxu1 }
 0x424   : > { %v967_v56 = vpop.xlane.xlu1 %966 }
 0x425   : > { %1549 = vrcp.f32 %v967_v56 }
 0x426   : > { %1551 = vrcp.f32 %v805_v61 }
 0x42f   : > { %v1550_v57 = vpop.eup %1549 }
 0x430   : > { %v1552_v7 = vpop.eup %1551 }
 0x431   : > { %v880_v9 = vmul.f32 %v1552_v7, %v876_v54 }
 0x469   : > { %v1042_v58 = vpop.f32.mrb[6].mxu1 }
 0x46a   : > { %v1046_v59 = vmul.f32 %v1550_v57, %v1042_v58  ;;  %v1426_v60 = vpop.f32.mrb[7].mxu1 }
 0x46c   : > { %1048 = vrot.lane.b32.xlu1 %v1046_v59, %s1819_s18 }
 0x4de   : > { %v1049_v11 = vpop.permute.xlu1 %1048 }
 0x4df   : > { %v1051_v12 = vsel %vm719_vm2, %v880_v9, %v1049_v11 }
 0x4e0   : > { %v1052_v13 = vcombine.high %v1051_v12, %v1817_v1  ;;  %v1059_v14 = vrot.slane %v1051_v12, %v1058_v8 }
 0x4e2   : > { %v1067_v15 = vcombine.high %v1059_v14, %v1817_v1  ;;  %v1074_v16 = vrot.slane %v1059_v14, %v1073_v10  ;;  %v1066_v17 = vrot.slane %v1052_v13, %v1058_v8 }
 0x4e4   : > { %v1097_v18 = vcombine.high %v1074_v16, %v1817_v1  ;;  %v1081_v19 = vrot.slane %v1067_v15, %v1073_v10  ;;  %v1089_v21 = vrot.slane %v1066_v17, %v1073_v10  ;;  %v1082_v23 = vcombine.high %v1066_v17, %v1817_v1 }
 0x4e6   : > { %1102 = vrot.lane.b32.xlu1 %v1097_v18, %s1822_s29  ;;  %v1098_v20 = vcombine.high %v1081_v19, %v1817_v1  ;;  %v1099_v22 = vcombine.high %v1089_v21, %v1817_v1  ;;  %v1096_v24 = vrot.slane %v1082_v23, %v1073_v10 }
 0x4e8   : > { %1110 = vrot.lane.b32.xlu0 %v1098_v20, %s1823_s16  ;;  %v1100_v25 = vcombine.high %v1096_v24, %v1817_v1 }
 0x4ea   : > { %1106 = vrot.lane.b32.xlu1 %v1081_v19, %s1824_s25 }
 0x4ee   : > { %1114 = vrot.lane.b32.xlu1 %v1099_v22, %s1822_s29 }
 0x4f2   : > { %1118 = vrot.lane.b32.xlu1 %v1096_v24, %s1824_s25 }
 0x4f6   : > { %1122 = vrot.lane.b32.xlu1 %v1100_v25, %s1823_s16 }
 0x558   : > { %v1103_v26 = vpop.permute.xlu1 %1102 }
 0x559   : > { %v1125_v33 = vsel %vm477_vm1, %v1074_v16, %v1103_v26 }
 0x55a   : > { %v1111_v36 = vpop.permute.xlu0 %1110 }
 0x55c   : > { %v1107_v27 = vpop.permute.xlu1 %1106 }
 0x55d   : > { %v1127_v34 = vsel %vm1126_vm4, %v1125_v33, %v1107_v27 }
 0x55e   : > { %v1129_v39 = vsel %vm1128_vm5, %v1127_v34, %v1111_v36 }
 0x560   : > { %v1115_v28 = vpop.permute.xlu1 %1114 }
 0x561   : > { %v1130_v35 = vsel %vm477_vm1, %v1089_v21, %v1115_v28 }
 0x564   : > { %v1119_v31 = vpop.permute.xlu1 %1118 }
 0x565   : > { %v1131_v1 = vsel %vm1126_vm4, %v1130_v35, %v1119_v31 }
 0x568   : > { %v1123_v38 = vpop.permute.xlu1 %1122 }
 0x569   : > { %v1132_v40 = vsel %vm1128_vm5, %v1131_v1, %v1123_v38 }
 0x56a   : > { %v1135_v41 = vcombine.low %v1129_v39, %v1132_v40 }
 0x56c   : > { %v1142_v42 = vrot.slane %v1135_v41, %v1141_v37 }
 0x56e   : > { %v1149_v43 = vrot.slane %v1142_v42, %v1141_v37 }
 0x570   : > { %1155 = vst.msk [vmem:[%s462_s3] sm:$0x3] %vm1153_vm6, %v1149_v43 }
 0x571   : > { %1740 = shalt.err (!%p1737_p5)
}
 0x572   : > { %s1741_s14 = scalar_lea.hbm %s2224_s30, 32  ;;  %s1745_s8 = scalar_lea.hbm %s2340_s19, 64 }
 0x573   : > { %p1742_p2 = scmp.ne.s32.totalorder %s2224_s30, %s1741_s14  ;;  %p1746_p12 = scmp.lt.u32.totalorder %s2224_s30, %s2340_s19 }
 0x574   : > { %p1747_p1 = scmp.lt.u32.totalorder %s1745_s8, %s1741_s14  ;;  %p1749_p10 = scmp.lt.u32.totalorder %s1741_s14, %s2224_s30 }
 0x575   : > { %p1743_p8 = pnand %p1742_p2, %p2341_p0 }
 0x576   : > { %p1748_p6 = por %p1747_p1, %p1746_p12 }
 0x577   : > { %p1744_p11 = pneg %p1743_p8 }
 0x578   : > { %p1750_p4 = por %p1749_p10, %p1748_p6 }
 0x57a   : > { %p1751_p9 = pnand %p1750_p4, %p1744_p11 }
 0x57c   : > { %1754 = shalt.err (!%p1751_p9)
}
 0x57d   : > { %1463 = dma.vmem_to_hbm [thread:$0]  (%p2341_p0), %s2226_s20, 32, %s2224_s30, %s1157_s15  }
 0x57e PF: > { %s2342_s29 = sld [smem:[#allocation19_spill]]  ;;  %s2343_s16 = sld [smem:[#allocation21_spill]] }
 0x57f   : > { %s2344_s25 = sld [smem:[#allocation20_spill]] }
 0x584   : > { %s1183_s23 = sand.u32 1, %s2342_s29   ;;  %p2345_p13 = scmp.ne.s32.totalorder %s2343_s16, 0 }
 0x585   : > { %p2346_p7 = scmp.ge.s32.totalorder %s2344_s25, 2  ;;  %s1184_s21 = scalar_lea.sflag [#allocation4], %s1183_s23 }
 0x587   : > { %p1486_p3 = pnand %p2346_p7, %p2345_p13 }
 0x589   : > { %1788 = dma.done.wait (!%p1486_p3), %s1184_s21, 32  }
 0x58a   : > { %1790 = vsyncadd (!%p1486_p3), %s1184_s21, 4294967264  ;;  %s2347_s12 = sld [smem:[#allocation22_spill]]  ;;  %s2348_s3 = sld [smem:[#allocation23_spill]] }
 0x58b   : > { %s2349_s30 = smov %s1797_s10  ;;  %s2350_s10 = smov %s1801_s11 }
 0x590   : > { %p27_p5 = scmp.ge.s32.totalorder %s2347_s12, 4   ;;  %s2351_s11 = smov %s2348_s3 }
 0x592   :  { %29 = sbr.rel (!%p27_p5) target bundleno = 14 (0xe), region = 137 }
 0x599   :  { %1189 = vsyncpa [#allocation3], 1 }
 0x59a   :  { %1191 = vsyncpa [#allocation3 + $0x1], 1 }
 0x59b   :  { %1192 = vsyncpa [#allocation6], 1 }
 0x59c   :  { %1194 = vsyncpa [#allocation6 + $0x1], 1 }
 0x59d   :  { %1195 = vsyncpa [#allocation9], 1 }
 0x59e   :  { %1196 = vsyncpa [#allocation12], 1 }
 0x59f   :  { %1197 = vsyncpa [#allocation4], 1 }
 0x5a0   :  { %1199 = vsyncpa [#allocation4 + $0x1], 1 }

</bundles_post_ra>
